<compile_context>
chip_gen: v6e
topology: v6e:2x2x1
jax: 0.10.0
libtpu: 0.0.40
codegen_flags: <defaults>
</compile_context>

<pallas_src>
import jax
import jax.numpy as jnp
from jax.experimental import pallas as pl
from jax.experimental.pallas import tpu as pltpu

LANE = 128      # feature / hidden / output dims padded to full lane width
SUBPAD = 16     # bf16 sublane packing -> pad N to a multiple of 16


def gcn_kernel(a_ref, x_ref, w_ref, b_ref, disc_ref, disr_ref, out_ref):
    """Fused GCN forward: conv1 -> relu -> (conv2 + mean-pool + linear).

    a_ref   : [N, N]         bf16  raw A + I   (normalization scaling fused here)
    x_ref   : [N, LANE]      bf16  node features, zero-padded to 128 lanes
    w_ref   : [2, LANE, LANE] bf16 stacked (W1 | W2@Wl), zero-padded
    b_ref   : [8, LANE]      f32   row 0 = b1, row 1 = b2@Wl + bl
    disc_ref: [N, 1]         f32   D^-1/2 (column layout; 0 on padded rows)
    disr_ref: [8, N]         bf16  row 0 = D^-1/2 / N_real (row layout), rest 0
    out_ref : [8, LANE]      f32   row 0 = logits (lane-dense, sublane-full)
    """
    dis_c = disc_ref[...]                                               # [N,1] f32

    # --- conv1:  relu( D^-1/2 (A+I) D^-1/2 (X W1) + b1 ) --------------------
    z = jnp.dot(x_ref[...], w_ref[0],
                preferred_element_type=jnp.float32)                     # [N,128]
    z = (z * dis_c).astype(jnp.bfloat16)                                # source-side D^-1/2
    # A is read straight from the ref at each consumer (bounded live range).
    h = jnp.dot(a_ref[...], z,
                preferred_element_type=jnp.float32)                     # MXU pass 1 over A
    h = h * dis_c + b_ref[0:1, :]                                       # dest-side D^-1/2 + b1
    h = jnp.maximum(h, 0.0)                                             # relu (f32 epilogue)
    # dropout(p=0.5): inference mode -> identity.
    # TODO(synk): training-mode dropout needs pltpu.prng_seed / prng_random_bits.

    # --- conv2 + mean-pool + linear, fused -----------------------------------
    #   out = (1/N) 1^T A_hat H (W2 Wl) + (b2 Wl + bl)
    #       = ((dis/N)^T (A+I)) @ (dis * H) @ Wc + bc
    # The O(N^2*H) second aggregation and the [N,H] h2 intermediate never exist.
    t = jnp.dot(disr_ref[...], a_ref[...],
                preferred_element_type=jnp.float32)                     # [8,N] MXU pass 2 over A
    hd = (h * dis_c).astype(jnp.bfloat16)                               # fold dis_j into rows of H
    pooled = jnp.dot(t.astype(jnp.bfloat16), hd,
                     preferred_element_type=jnp.float32)                # [8,128] (row 0 valid)
    out_ref[...] = (jnp.dot(pooled.astype(jnp.bfloat16), w_ref[1],
                            preferred_element_type=jnp.float32)
                    + b_ref[1:2, :])


def _pad2(x, rows, cols):
    return jnp.zeros((rows, cols), x.dtype).at[:x.shape[0], :x.shape[1]].set(x)


def gcn_forward(x, edge_index, params):
    """x: [N, 1, F] (module does x.squeeze(1)); edge_index: [2, E]."""
    xs = jnp.squeeze(x, axis=1).astype(jnp.float32)            # [N, F]
    n, f = xs.shape
    h_real = params["w1"].shape[1]
    c_real = params["wl"].shape[1]
    assert f <= LANE and h_real <= LANE and c_real <= LANE

    n_pad = max(SUBPAD, ((n + SUBPAD - 1) // SUBPAD) * SUBPAD)

    # Raw A + I in f32 (exact).  NOTE: .set dedups parallel edges (same caveat
    # as before vs. PyG's summing to_dense_adj for multigraphs).
    src, dst = edge_index[0], edge_index[1]
    adj = jnp.zeros((n, n), jnp.float32).at[dst, src].set(1.0)
    adj = adj + jnp.eye(n, dtype=jnp.float32)

    # D^-1/2: O(N) vector, computed exactly in f32 here (no in-kernel f32 [N,N]
    # upcast).  Padded / isolated rows get 0, which zeroes their contribution.
    deg = jnp.sum(adj, axis=1)                                  # [N] f32, exact
    dis = jnp.where(deg > 0.0, jax.lax.rsqrt(jnp.maximum(deg, 1.0)), 0.0)

    adj_p = jnp.zeros((n_pad, n_pad), jnp.bfloat16).at[:n, :n].set(
        adj.astype(jnp.bfloat16))                               # 0/1/2 values: exact in bf16
    x_pad = jnp.zeros((n_pad, LANE), jnp.bfloat16).at[:n, :f].set(
        xs.astype(jnp.bfloat16))
    dis_col = jnp.zeros((n_pad, 1), jnp.float32).at[:n, 0].set(dis)
    dis_row = jnp.zeros((8, n_pad), jnp.float32).at[0, :n].set(
        dis / n).astype(jnp.bfloat16)                           # 1/N folded in (real N)

    # Fold the final Linear into conv2's weight (no nonlinearity in between).
    wc = params["w2"] @ params["wl"]                            # [H, C] f32
    bc = params["b2"] @ params["wl"] + params["bl"]             # [1, C] f32
    w = jnp.stack([_pad2(params["w1"], LANE, LANE),
                   _pad2(wc, LANE, LANE)]).astype(jnp.bfloat16)  # [2,128,128]
    b = jnp.zeros((8, LANE), jnp.float32)
    b = b.at[0, :h_real].set(params["b1"].reshape(-1))
    b = b.at[1, :c_real].set(bc.reshape(-1))

    vmem = pl.BlockSpec(memory_space=pltpu.MemorySpace.VMEM)

    bytes_accessed = (adj_p.size * 2 + x_pad.size * 2 + w.size * 2
                      + b.size * 4 + dis_col.size * 4 + dis_row.size * 2
                      + 8 * LANE * 4)
    flops = 2 * (n_pad * LANE * LANE          # X @ W1
                 + n_pad * n_pad * LANE       # (A+I) @ Z
                 + 8 * n_pad * n_pad          # (dis/N)^T @ (A+I)
                 + 8 * n_pad * LANE           # t @ (dis*H)
                 + 8 * LANE * LANE)           # pooled @ Wc
    vmem_limit = int(min(48 * 1024 * 1024,
                         max(16 * 1024 * 1024, 2 * bytes_accessed + (4 << 20))))

    out = pl.pallas_call(
        gcn_kernel,
        out_shape=jax.ShapeDtypeStruct((8, LANE), jnp.float32),
        in_specs=[vmem] * 6,
        out_specs=vmem,
        compiler_params=pltpu.CompilerParams(vmem_limit_bytes=vmem_limit),
        cost_estimate=pl.CostEstimate(flops=int(flops), transcendentals=0,
                                      bytes_accessed=int(bytes_accessed)),
    )(adj_p, x_pad, w, b, dis_col, dis_row)
    return out[0:1, :c_real]                                    # [1, C]


def init_params(key, num_node_features, hidden_channels, output_channels):
    k1, k2, k3 = jax.random.split(key, 3)

    def glorot(k, fan_in, fan_out):
        s = jnp.sqrt(6.0 / (fan_in + fan_out))
        return jax.random.uniform(k, (fan_in, fan_out), jnp.float32, -s, s)

    return {
        "w1": glorot(k1, num_node_features, hidden_channels),
        "b1": jnp.zeros((1, hidden_channels), jnp.float32),
        "w2": glorot(k2, hidden_channels, hidden_channels),
        "b2": jnp.zeros((1, hidden_channels), jnp.float32),
        "wl": glorot(k3, hidden_channels, output_channels),
        "bl": jnp.zeros((1, output_channels), jnp.float32),
    }


if __name__ == "__main__":
    NUM_NODES = 8
    NUM_NODE_FEATURES = 4
    HIDDEN_CHANNELS = 32
    OUTPUT_CHANNELS = 4

    key = jax.random.PRNGKey(0)
    k_x, k_p = jax.random.split(key)

    # node features [N, 1, F]  (the module does x.squeeze(1))
    x = jax.random.normal(k_x, (NUM_NODES, 1, NUM_NODE_FEATURES), jnp.float32)

    # deterministic ring graph, both directions: [2, E]
    src = jnp.arange(NUM_NODES, dtype=jnp.int32)
    dst = (src + 1) % NUM_NODES
    edge_index = jnp.stack(
        [jnp.concatenate([src, dst]), jnp.concatenate([dst, src])], axis=0)

    params = init_params(k_p, NUM_NODE_FEATURES, HIDDEN_CHANNELS,
                         OUTPUT_CHANNELS)

    out = gcn_forward(x, edge_index, params)
    out = jax.block_until_ready(out)
    assert out.shape == (1, OUTPUT_CHANNELS)

    # Pure-JAX reference: original (un-fused) module math in f32, on the same
    # bf16-quantized inputs the kernel receives.  Remaining tolerance covers
    # the kernel's bf16 intermediate casts and the W2@Wl fold (~1% relative).
    q = lambda t: t.astype(jnp.bfloat16).astype(jnp.float32)
    xs = q(jnp.squeeze(x, axis=1))
    adj = jnp.zeros((NUM_NODES, NUM_NODES), jnp.float32)
    adj = adj.at[edge_index[1], edge_index[0]].set(1.0)
    adj = adj + jnp.eye(NUM_NODES, dtype=jnp.float32)
    deg = jnp.sum(adj, axis=1)
    d_inv_sqrt = jax.lax.rsqrt(jnp.maximum(deg, 1e-12))
    a_hat = adj * d_inv_sqrt[:, None] * d_inv_sqrt[None, :]
    w1, w2, wl = q(params["w1"]), q(params["w2"]), q(params["wl"])
    h = jnp.maximum(a_hat @ (xs @ w1) + params["b1"], 0.0)
    h2 = a_hat @ (h @ w2) + params["b2"]
    ref = jnp.mean(h2, axis=0, keepdims=True) @ wl + params["bl"]
    assert jnp.allclose(out, ref, atol=2.5e-2, rtol=2.5e-2), (out, ref)

    print("KERNEL_OK")
</pallas_src>

<mosaic_0001>
module attributes {stable_mosaic.version = 11 : i64} {
  func.func @gcn_kernel(%arg0: memref<16x16xbf16, #tpu.memory_space<vmem>>, %arg1: memref<16x128xbf16, #tpu.memory_space<vmem>>, %arg2: memref<2x128x128xbf16, #tpu.memory_space<vmem>>, %arg3: memref<8x128xf32, #tpu.memory_space<vmem>>, %arg4: memref<16x1xf32, #tpu.memory_space<vmem>>, %arg5: memref<8x16xbf16, #tpu.memory_space<vmem>>, %arg6: memref<8x128xf32, #tpu.memory_space<vmem>>) attributes {dimension_semantics = [], scalar_prefetch = 0 : i64, scratch_operands = 0 : i64, tpu.core_type = #tpu.core_type<tc>} {
    %c0 = arith.constant 0 : index
    %c0_0 = arith.constant 0 : index
    %0 = vector.load %arg4[%c0, %c0_0] : memref<16x1xf32, #tpu.memory_space<vmem>>, vector<16x1xf32>
    %c0_1 = arith.constant 0 : index
    %c0_2 = arith.constant 0 : index
    %1 = vector.load %arg1[%c0_1, %c0_2] : memref<16x128xbf16, #tpu.memory_space<vmem>>, vector<16x128xbf16>
    %c0_3 = arith.constant 0 : index
    %c0_4 = arith.constant 0 : index
    %c0_5 = arith.constant 0 : index
    %2 = vector.load %arg2[%c0_3, %c0_4, %c0_5] : memref<2x128x128xbf16, #tpu.memory_space<vmem>>, vector<1x128x128xbf16>
    %3 = vector.shape_cast %2 : vector<1x128x128xbf16> to vector<128x128xbf16>
    %cst = arith.constant dense<0.000000e+00> : vector<16x128xf32>
    %4 = tpu.matmul %1, %3, %cst {dimension_numbers = #tpu.dot_dimension_numbers<[1], [0], [0], [1], [0, 0, 1, 1], [], []>} : vector<16x128xbf16>, vector<128x128xbf16>, vector<16x128xf32> -> vector<16x128xf32>
    %5 = vector.broadcast %0 : vector<16x1xf32> to vector<16x128xf32>
    %6 = arith.mulf %4, %5 : vector<16x128xf32>
    %7 = arith.truncf %6 : vector<16x128xf32> to vector<16x128xbf16>
    %c0_6 = arith.constant 0 : index
    %c0_7 = arith.constant 0 : index
    %8 = vector.load %arg0[%c0_6, %c0_7] : memref<16x16xbf16, #tpu.memory_space<vmem>>, vector<16x16xbf16>
    %cst_8 = arith.constant dense<0.000000e+00> : vector<16x128xf32>
    %9 = tpu.matmul %8, %7, %cst_8 {dimension_numbers = #tpu.dot_dimension_numbers<[1], [0], [0], [1], [0, 0, 1, 1], [], []>} : vector<16x16xbf16>, vector<16x128xbf16>, vector<16x128xf32> -> vector<16x128xf32>
    %10 = vector.broadcast %0 : vector<16x1xf32> to vector<16x128xf32>
    %11 = arith.mulf %9, %10 : vector<16x128xf32>
    %c0_9 = arith.constant 0 : index
    %c0_10 = arith.constant 0 : index
    %12 = vector.load %arg3[%c0_9, %c0_10] : memref<8x128xf32, #tpu.memory_space<vmem>>, vector<1x128xf32>
    %13 = vector.broadcast %12 : vector<1x128xf32> to vector<16x128xf32>
    %14 = arith.addf %11, %13 : vector<16x128xf32>
    %cst_11 = arith.constant 0.000000e+00 : f32
    %15 = vector.broadcast %cst_11 : f32 to vector<16x128xf32>
    %16 = arith.maximumf %14, %15 : vector<16x128xf32>
    %c0_12 = arith.constant 0 : index
    %c0_13 = arith.constant 0 : index
    %17 = vector.load %arg5[%c0_12, %c0_13] : memref<8x16xbf16, #tpu.memory_space<vmem>>, vector<8x16xbf16>
    %c0_14 = arith.constant 0 : index
    %c0_15 = arith.constant 0 : index
    %18 = vector.load %arg0[%c0_14, %c0_15] : memref<16x16xbf16, #tpu.memory_space<vmem>>, vector<16x16xbf16>
    %cst_16 = arith.constant dense<0.000000e+00> : vector<8x16xf32>
    %19 = tpu.matmul %17, %18, %cst_16 {dimension_numbers = #tpu.dot_dimension_numbers<[1], [0], [0], [1], [0, 0, 1, 1], [], []>} : vector<8x16xbf16>, vector<16x16xbf16>, vector<8x16xf32> -> vector<8x16xf32>
    %20 = vector.broadcast %0 : vector<16x1xf32> to vector<16x128xf32>
    %21 = arith.mulf %16, %20 : vector<16x128xf32>
    %22 = arith.truncf %21 : vector<16x128xf32> to vector<16x128xbf16>
    %23 = arith.truncf %19 : vector<8x16xf32> to vector<8x16xbf16>
    %cst_17 = arith.constant dense<0.000000e+00> : vector<8x128xf32>
    %24 = tpu.matmul %23, %22, %cst_17 {dimension_numbers = #tpu.dot_dimension_numbers<[1], [0], [0], [1], [0, 0, 1, 1], [], []>} : vector<8x16xbf16>, vector<16x128xbf16>, vector<8x128xf32> -> vector<8x128xf32>
    %25 = arith.truncf %24 : vector<8x128xf32> to vector<8x128xbf16>
    %c1 = arith.constant 1 : index
    %c0_18 = arith.constant 0 : index
    %c0_19 = arith.constant 0 : index
    %26 = vector.load %arg2[%c1, %c0_18, %c0_19] : memref<2x128x128xbf16, #tpu.memory_space<vmem>>, vector<1x128x128xbf16>
    %27 = vector.shape_cast %26 : vector<1x128x128xbf16> to vector<128x128xbf16>
    %cst_20 = arith.constant dense<0.000000e+00> : vector<8x128xf32>
    %28 = tpu.matmul %25, %27, %cst_20 {dimension_numbers = #tpu.dot_dimension_numbers<[1], [0], [0], [1], [0, 0, 1, 1], [], []>} : vector<8x128xbf16>, vector<128x128xbf16>, vector<8x128xf32> -> vector<8x128xf32>
    %c1_21 = arith.constant 1 : index
    %c0_22 = arith.constant 0 : index
    %29 = vector.load %arg3[%c1_21, %c0_22] : memref<8x128xf32, #tpu.memory_space<vmem>>, vector<1x128xf32>
    %30 = vector.broadcast %29 : vector<1x128xf32> to vector<8x128xf32>
    %31 = arith.addf %28, %30 : vector<8x128xf32>
    %c0_23 = arith.constant 0 : index
    %c0_24 = arith.constant 0 : index
    %32 = vector.load %arg6[%c0_23, %c0_24] : memref<8x128xf32, #tpu.memory_space<vmem>>, vector<8x128xf32>
    tpu.vector_store %arg6[%c0_23, %c0_24], %31 {strides = array<i32>} : memref<8x128xf32, #tpu.memory_space<vmem>>, vector<8x128xf32>,
    return
  }
}

</mosaic_0001>

<bundles_post_ra>
// kernel: tpu_custom_call.1
= control target key start
LH: loop header
LB: loop body
LE: loop exit
PB: predicated region body
PF: predicated region fallthrough
CT: control target
= control target key end

     0   :  { %11 = vsyncpa [#allocation3], 0  ;;  %s759_s0 = inlined_call_operand.vmem [shape: bf16[16,16], index: 0, kind: input, shape index: {}]   ;;  %s760_s1 = inlined_call_operand.vmem [shape: bf16[16,128], index: 1, kind: input, shape index: {}]   ;;  %s761_s2 = inlined_call_operand.hbm [shape: bf16[2,128,128], index: 2, kind: input, shape index: {}]   ;;  %s762_s3 = inlined_call_operand.hbm [shape: f32[8,128], index: 3, kind: input, shape index: {}]   ;;  %s763_s4 = inlined_call_operand.vmem [shape: f32[16,1], index: 4, kind: input, shape index: {}]   ;;  %s764_s5 = inlined_call_operand.vmem [shape: bf16[8,16], index: 5, kind: input, shape index: {}]   ;;  %s765_s6 = inlined_call_operand.hbm [shape: f32[8,128], index: 6, kind: output, shape index: {}]  }
   0x1   :  { %12 = vsyncpa [#allocation6], 0 }
   0x2   :  { %13 = vsyncpa [#allocation4], 0  ;;  %s660_s21 = smov [#allocation2]  }
   0x3   :  { %s23_s22 = sshll.u32 %s660_s21, 4  ;;  %s24_s22 = int_to_ptr.vmem [resolvable:$true] %s23_s22 }
   0x4   :  { %s602_s23 = scalar_lea.vmem %s24_s22, 2048  ;;  %p607_p1 = scmp.lt.s32.totalorder %s24_s22, %s24_s22 }
   0x5   :  { %p603_p0 = scmp.ne.s32.totalorder %s24_s22, %s602_s23  ;;  %p608_p2 = scmp.lt.s32.totalorder %s602_s23, %s602_s23 }
   0x7   :  { %p609_p3 = por %p608_p2, %p607_p1 }
   0x9   :  { %p610_p4 = pnand %p609_p3, %p603_p0 }
   0xb   :  { %613 = shalt.err (!%p610_p4)
}
   0xc   :  { %s661_s24 = smov 64   ;;  %s662_s25 = smov 4  }
   0xd   :  { %29 = dma.hbm_to_vmem [thread:$0]  %s761_s2, 2048, %s24_s22, [#allocation3], %s661_s24, %s661_s24, %s662_s25  }
   0xe   :  { %s663_s28 = smov [#allocation5]  }
   0xf   :  { %s36_s29 = sshll.u32 %s663_s28, 4  ;;  %s37_s29 = int_to_ptr.vmem [resolvable:$true] %s36_s29 }
  0x10   :  { %s622_s30 = scalar_lea.vmem %s37_s29, 128  ;;  %p627_p6 = scmp.lt.s32.totalorder %s37_s29, %s37_s29 }
  0x11   :  { %p623_p5 = scmp.ne.s32.totalorder %s37_s29, %s622_s30  ;;  %p628_p7 = scmp.lt.s32.totalorder %s622_s30, %s622_s30 }
  0x13   :  { %p629_p8 = por %p628_p7, %p627_p6 }
  0x15   :  { %p630_p9 = pnand %p629_p8, %p623_p5 }
  0x17   :  { %633 = shalt.err (!%p630_p9)
}
  0x18   :  { %39 = dma.hbm_to_vmem [thread:$0]  %s762_s3, 128, %s37_s29, [#allocation6]  }
  0x19   :  { %654 = dma.done.wait [#allocation3], 2048  }
  0x1a   :  { %655 = vsyncadd [#allocation3], 4294965248 }
  0x1b   :  { %656 = dma.done.wait [#allocation6], 128  }
  0x1c   :  { %657 = vsyncadd [#allocation6], 4294967168  ;;  %v664_v0 = vmov 0.0   ;;  %vm665_vm0 = vmmov 0   ;;  %v666_v1 = vmov 0   ;;  %v576_v2 = vld [vmem:[#allocation2 + $0x38] sm:$0xff]  }
  0x1d   :  { %509 = vmatprep.subr.bf16.mxu0 %v664_v0  ;;  %525 = vmatprep.mubr.msk.bf16.mxu0 %vm665_vm0, %v664_v0  ;;  %v577_v3 = vld [vmem:[#allocation2 + $0x30] sm:$0xff]   ;;  %v578_v4 = vld [vmem:[#allocation2 + $0x28] sm:$0xff]   ;;  %v579_v5 = vld [vmem:[#allocation2 + $0x20] sm:$0xff]   ;;  %vm186_vm1 = vcmask 130048  }
  0x1e   :  { %575 = vset.pattern.permute.xlu0 %v666_v1  ;;  %535 = vmatprep.subr.bf16.mxu1 %v664_v0  ;;  %v51_v6 = vld [vmem:[%s763_s4] sm:$0xff]  ;;  %v52_v7 = vld [vmem:[%s763_s4 + $0x8] sm:$0xff]  ;;  %v580_v8 = vld [vmem:[#allocation2 + $0x18] sm:$0xff]  }
  0x1f   :  { %537 = vmatprep.mubr.msk.bf16.mxu1 %vm665_vm0, %v664_v0  ;;  %510 = vmatpush3.bf16.msra.mxu0 %v576_v2  ;;  %v581_v9 = vld [vmem:[#allocation2 + $0x10] sm:$0xff]   ;;  %v582_v10 = vld [vmem:[#allocation2 + $0x8] sm:$0xff]   ;;  %v583_v11 = vld [vmem:[#allocation2] sm:$0xff]  }
  0x20   :  { %511 = vmatprep.subr.bf16.mxu0 %v664_v0  ;;  %168 = vperm.xlu0 %575, %v51_v6   ;;  %v584_v12 = vld [vmem:[%s760_s1] sm:$0xff]   ;;  %v586_v43 = vld [vmem:[#allocation2 + $0x78] sm:$0xff]   ;;  %v587_v44 = vld [vmem:[#allocation2 + $0x70] sm:$0xff]  }
  0x21   :  { %v585_v13 = vld [vmem:[%s759_s0] sm:$0xff]   ;;  %v588_v45 = vld [vmem:[#allocation2 + $0x68] sm:$0xff]   ;;  %v590_v47 = vld [vmem:[#allocation2 + $0x58] sm:$0xff]   ;;  %s667_s0 = smov [#allocation7]  }
  0x22   :  { %536 = vmatpush3.bf16.msra.mxu1 %v585_v13  ;;  %v242_v14 = vld [vmem:[%s764_s5] sm:$0xf]  ;;  %v591_v48 = vld [vmem:[#allocation2 + $0x50] sm:$0xff]   ;;  %v592_v49 = vld [vmem:[#allocation2 + $0x48] sm:$0xff]   ;;  %s452_s1 = sshll.u32 %s667_s0, 4  ;;  %s453_s1 = int_to_ptr.vmem [resolvable:$true] %s452_s1 }
  0x23   :  { %512 = vmatpush3.bf16.msra.mxu0 %v577_v3  ;;  %541 = vmatprep.subr.bf16.mxu1 %v664_v0  ;;  %v473_v29 = vld [vmem:[#allocation5] ss:$0 sm:$0xff]  ;;  %v476_v56 = vld [vmem:[#allocation5 + $0x1] ss:$0 sm:$0xff]  ;;  %s634_s5 = scalar_lea.vmem %s453_s1, 128  ;;  %p639_p11 = scmp.lt.s32.totalorder %s453_s1, %s453_s1 }
  0x24   :  { %513 = vmatprep.subr.bf16.mxu0 %v664_v0  ;;  %173 = vperm.xlu0 %575, %v52_v7   ;;  %v589_v46 = vld [vmem:[#allocation2 + $0x60] sm:$0xff]   ;;  %p635_p10 = scmp.ne.s32.totalorder %s453_s1, %s634_s5  ;;  %p640_p12 = scmp.lt.s32.totalorder %s634_s5, %s634_s5 }
  0x25   :  { %538 = vmatmul.mubr.msk.bf16.vlgmr.msra.gmra.mxu1 %vm186_vm1, %v242_v14  ;;  %v593_v50 = vld [vmem:[#allocation2 + $0x40] sm:$0xff]  }
  0x26   :  { %543 = vmatprep.mubr.msk.bf16.mxu1 %vm665_vm0, %v664_v0  ;;  %p641_p13 = por %p640_p12, %p639_p11 }
  0x27   :  { %514 = vmatpush3.bf16.msra.mxu0 %v578_v4 }
  0x28   :  { %515 = vmatprep.subr.bf16.mxu0 %v664_v0  ;;  %p642_p0 = pnand %p641_p13, %p635_p10 }
  0x2b   :  { %516 = vmatpush3.bf16.msra.mxu0 %v579_v5 }
  0x2c   :  { %517 = vmatprep.subr.bf16.mxu0 %v664_v0 }
  0x2f   :  { %518 = vmatpush3.bf16.msra.mxu0 %v580_v8 }
  0x30   :  { %519 = vmatprep.subr.bf16.mxu0 %v664_v0 }
  0x33   :  { %520 = vmatpush3.bf16.msra.mxu0 %v581_v9 }
  0x34   :  { %521 = vmatprep.subr.bf16.mxu0 %v664_v0 }
  0x37   :  { %522 = vmatpush3.bf16.msra.mxu0 %v582_v10 }
  0x38   :  { %523 = vmatprep.subr.bf16.mxu0 %v664_v0 }
  0x3b   :  { %524 = vmatpush3.bf16.msra.mxu0 %v583_v11 }
  0x3c   :  { %529 = vmatprep.subr.bf16.mxu0 %v664_v0 }
  0x3e   :  { %526 = vmatmul.mubr.bf16.vlgmr.msra.gmra.mxu0 %v584_v12 }
  0x3f   :  { %531 = vmatprep.mubr.msk.bf16.mxu0 %vm665_vm0, %v664_v0 }
  0x9b   :  { %v169_v15 = vpop.permute.xlu0 %168 }
  0x9f   :  { %v174_v18 = vpop.permute.xlu0 %173 }
  0xe5   :  { %v281_v24 = vpop.f32.mrf.mxu1 }
  0xe6   :  { %v290_v42 = vpack.c.bf16 %v281_v24, %v281_v24 }
  0xe7   :  { %v539_v25 = vpop.f32.mrf.mxu1 }
  0xe9   :  { %v284_v26 = vpop.f32.mrf.mxu1 }
  0xeb   :  { %v540_v27 = vpop.f32.mrf.mxu1 }
  0xfe   :  { %v159_v16 = vpop.f32.mrf.mxu0 }
  0xff   :  { %v176_v20 = vmul.f32 %v169_v15, %v159_v16 }
 0x100   :  { %v527_v17 = vpop.f32.mrf.mxu0 }
 0x102   :  { %v162_v19 = vpop.f32.mrf.mxu0 }
 0x103   :  { %v177_v21 = vmul.f32 %v174_v18, %v162_v19 }
 0x104   :  { %v528_v22 = vpop.f32.mrf.mxu0 }
 0x105   :  { %v178_v23 = vpack.c.bf16 %v177_v21, %v176_v20 }
 0x107   :  { %530 = vmatpush3.bf16.msra.mxu0 %v178_v23 }
 0x10a   :  { %532 = vmatmul.mubr.msk.bf16.vlgmr.msra.gmra.mxu0 %vm186_vm1, %v585_v13 }
 0x1ca   :  { %v224_v28 = vpop.f32.mrf.mxu0 }
 0x1cb   :  { %v231_v30 = vmul.f32 %v224_v28, %v169_v15 }
 0x1cc   :  { %v533_v31 = vpop.f32.mrf.mxu0 }
 0x1cd   :  { %v238_v32 = vadd.f32 %v473_v29, %v231_v30 }
 0x1ce   :  { %v227_v33 = vpop.f32.mrf.mxu0 }
 0x1cf   :  { %v232_v34 = vmul.f32 %v227_v33, %v174_v18  ;;  %v240_v36 = vmax.f32 %v238_v32, 0.0 }
 0x1d0   :  { %v534_v35 = vpop.f32.mrf.mxu0 }
 0x1d1   :  { %v239_v37 = vadd.f32 %v473_v29, %v232_v34  ;;  %v287_v39 = vmul.f32 %v240_v36, %v169_v15 }
 0x1d3   :  { %v241_v38 = vmax.f32 %v239_v37, 0.0 }
 0x1d5   :  { %v288_v40 = vmul.f32 %v241_v38, %v174_v18 }
 0x1d7   :  { %v289_v41 = vpack.c.bf16 %v288_v40, %v287_v39 }
 0x1d9   :  { %542 = vmatpush3.bf16.msra.mxu1 %v289_v41 }
 0x1da   :  { %547 = vmatprep.subr.bf16.mxu1 %v664_v0 }
 0x1dc   :  { %544 = vmatmul.mubr.msk.bf16.vlgmr.msra.gmra.mxu1 %vm186_vm1, %v290_v42 }
 0x1dd   :  { %548 = vmatpush3.bf16.msra.mxu1 %v586_v43  ;;  %563 = vmatprep.mubr.msk.bf16.mxu1 %vm665_vm0, %v664_v0 }
 0x1de   :  { %549 = vmatprep.subr.bf16.mxu1 %v664_v0 }
 0x1e1   :  { %550 = vmatpush3.bf16.msra.mxu1 %v587_v44 }
 0x1e2   :  { %551 = vmatprep.subr.bf16.mxu1 %v664_v0 }
 0x1e5   :  { %552 = vmatpush3.bf16.msra.mxu1 %v588_v45 }
 0x1e6   :  { %553 = vmatprep.subr.bf16.mxu1 %v664_v0 }
 0x1e9   :  { %554 = vmatpush3.bf16.msra.mxu1 %v589_v46 }
 0x1ea   :  { %555 = vmatprep.subr.bf16.mxu1 %v664_v0 }
 0x1ed   :  { %556 = vmatpush3.bf16.msra.mxu1 %v590_v47 }
 0x1ee   :  { %557 = vmatprep.subr.bf16.mxu1 %v664_v0 }
 0x1f1   :  { %558 = vmatpush3.bf16.msra.mxu1 %v591_v48 }
 0x1f2   :  { %559 = vmatprep.subr.bf16.mxu1 %v664_v0 }
 0x1f5   :  { %560 = vmatpush3.bf16.msra.mxu1 %v592_v49 }
 0x1f6   :  { %561 = vmatprep.subr.bf16.mxu1 %v664_v0 }
 0x1f9   :  { %562 = vmatpush3.bf16.msra.mxu1 %v593_v50 }
 0x29c   :  { %v328_v51 = vpop.f32.mrf.mxu1 }
 0x29d   :  { %v334_v52 = vpack.c.bf16 %v328_v51, %v328_v51 }
 0x29e   :  { %v545_v53 = vpop.f32.mrf.mxu1 }
 0x29f   :  { %564 = vmatmul.mubr.bf16.vlgmr.msra.gmra.mxu1 %v334_v52 }
 0x2a0   :  { %v331_v54 = vpop.f32.mrf.mxu1 }
 0x2a2   :  { %v546_v55 = vpop.f32.mrf.mxu1 }
 0x35f   :  { %v439_v57 = vpop.f32.mrf.mxu1 }
 0x360   :  { %v440_v58 = vadd.f32 %v476_v56, %v439_v57 }
 0x361   :  { %v565_v59 = vpop.f32.mrf.mxu1 }
 0x362   :  { %445 = vst [vmem:[#allocation7] sm:$0xff] %v440_v58 }
 0x363   :  { %v442_v60 = vpop.f32.mrf.mxu1 }
 0x364   :  { %645 = shalt.err (!%p642_p0)
}
 0x365   :  { %455 = dma.vmem_to_hbm [thread:$0]  %s453_s1, 128, %s765_s6, [#allocation4]   ;;  %v566_v61 = vpop.f32.mrf.mxu1 }
 0x366   :  { %658 = dma.done.wait [#allocation4], 128  }
 0x367   :  { %659 = vsyncadd [#allocation4], 4294967168 }
 0x368   :  { %459 = vsyncpa [#allocation3], 1 }
 0x369   :  { %460 = vsyncpa [#allocation6], 1 }
 0x36a   :  { %461 = vsyncpa [#allocation4], 1 }

</bundles_post_ra>
